<compile_context>
chip_gen: v7x
topology: tpu7x:2x2x1
jax: 0.10.0
libtpu: 0.0.40
codegen_flags: <defaults>
</compile_context>

<pallas_src>
import jax
import jax.numpy as jnp
from jax.experimental import pallas as pl
from jax.experimental.pallas import tpu as pltpu


def _round_up(n, m):
    return ((n + m - 1) // m) * m


def vae_kernel(x_ref, eps_ref,
               w1_ref, b1_ref,
               w21_ref, b21_ref,
               w22_ref, b22_ref,
               w3_ref, b3_ref,
               w4_ref, b4_ref,
               recon_ref, mu_ref, logvar_ref):
    wdt = w1_ref.dtype            # bf16 (or f32); dots accumulate in f32 either way
    x = x_ref[...]

    # encode: h1 = relu(x @ W1 + b1)       (bias add + ReLU in f32)
    h1 = jnp.dot(x.astype(wdt), w1_ref[...],
                 preferred_element_type=jnp.float32) + b1_ref[...]
    h1 = jnp.maximum(h1, 0.0)
    h1c = h1.astype(wdt)

    # mu / logvar heads — emitted at native width, no in-kernel/wrapper slicing
    mu = jnp.dot(h1c, w21_ref[...], preferred_element_type=jnp.float32) + b21_ref[...]
    logvar = jnp.dot(h1c, w22_ref[...], preferred_element_type=jnp.float32) + b22_ref[...]
    mu_ref[...] = mu
    logvar_ref[...] = logvar

    # reparameterize: z = mu + eps * exp(0.5 * logvar)     (f32, exp on EUP)
    z = mu + eps_ref[...] * jnp.exp(0.5 * logvar)

    # decode: sigmoid(relu(z @ W3 + b3) @ W4 + b4)
    h3 = jnp.dot(z.astype(wdt), w3_ref[...],
                 preferred_element_type=jnp.float32) + b3_ref[...]
    h3 = jnp.maximum(h3, 0.0)
    logits = jnp.dot(h3.astype(wdt), w4_ref[...],
                     preferred_element_type=jnp.float32) + b4_ref[...]
    # exp (EUP) + approximate reciprocal (EUP) instead of a VALU divide
    recon_ref[...] = pl.reciprocal(1.0 + jnp.exp(-logits), approx=True)


def prepare_params(torch_params, weight_dtype=jnp.bfloat16):
    """One-time prep of PyTorch-layout params: transpose weights to (in, out) and cast
    to `weight_dtype` (bf16 = MXU-native on v6e/v7x, half the resident VMEM/DMA);
    biases stay f32 as (1, out) since they're added after the f32 accumulation.
    Call ONCE and reuse — nothing here runs per forward call."""
    (w1, b1, w21, b21, w22, b22, w3, b3, w4, b4) = torch_params

    def prep(w, b):
        return (w.T.astype(weight_dtype),
                b.reshape(1, -1).astype(jnp.float32))

    p1 = prep(w1, b1)
    p21 = prep(w21, b21)
    p22 = prep(w22, b22)
    p3 = prep(w3, b3)
    p4 = prep(w4, b4)
    return p1 + p21 + p22 + p3 + p4


def vae_forward(x, eps, prep, *, max_tile_b=512, min_grid=4):
    """Fused VAE forward. Returns (recon, mu, logvar) at the original sizes."""
    (w1, b1, w21, b21, w22, b22, w3, b3, w4, b4) = prep
    B, in_dim = x.shape
    hid = w1.shape[1]
    lat = w21.shape[1]

    # Batch tiling: rows are a multiple of 8; aim for >= min_grid steps so each
    # TensorCore (2 on v7x) gets >= 2 steps and input/output DMAs stay pipelined.
    b8 = _round_up(B, 8)
    tile_b = min(max_tile_b, max(8, _round_up(pl.cdiv(b8, min_grid), 8)))
    b_pad = _round_up(b8, tile_b)
    n_tiles = b_pad // tile_b

    x_in = x.astype(jnp.float32)
    eps_in = eps.astype(jnp.float32)
    if b_pad != B:
        # NOTE: padding rows push relu(b1)-derived garbage through the whole network;
        # they are sliced off below and never reduced over, so it's wasted work only.
        x_in = jnp.pad(x_in, ((0, b_pad - B), (0, 0)))
        eps_in = jnp.pad(eps_in, ((0, b_pad - B), (0, 0)))

    vmem = pltpu.MemorySpace.VMEM

    def stream_spec(cols):
        # last block dim == full array dim -> legal without 128-lane padding
        return pl.BlockSpec((tile_b, cols), lambda i: (i, 0), memory_space=vmem)

    def resident_spec(a):
        # constant index_map -> stays resident in VMEM across all grid steps
        return pl.BlockSpec(a.shape, lambda i: (0, 0), memory_space=vmem)

    weights = (w1, b1, w21, b21, w22, b22, w3, b3, w4, b4)
    in_specs = [stream_spec(in_dim), stream_spec(lat)] + [resident_spec(a) for a in weights]
    # TODO(synk): if profiles still show the x-tile DMA exposed at large B, add
    # pipeline_mode=pl.Buffered(3) to the x BlockSpec only.

    out_shapes = (
        jax.ShapeDtypeStruct((b_pad, in_dim), jnp.float32),   # recon
        jax.ShapeDtypeStruct((b_pad, lat), jnp.float32),      # mu
        jax.ShapeDtypeStruct((b_pad, lat), jnp.float32),      # logvar
    )
    out_specs = (stream_spec(in_dim), stream_spec(lat), stream_spec(lat))

    flops = 2 * b_pad * (in_dim * hid + 2 * hid * lat + lat * hid + hid * in_dim)
    transcendentals = b_pad * (lat + 2 * in_dim)   # exp(logvar), exp(-logits), recip
    bytes_accessed = ((x_in.size + eps_in.size) * 4
                      + sum(int(a.size) * a.dtype.itemsize for a in weights)
                      + b_pad * (in_dim + 2 * lat) * 4)

    recon, mu, logvar = pl.pallas_call(
        vae_kernel,
        grid=(n_tiles,),
        in_specs=in_specs,
        out_specs=out_specs,
        out_shape=out_shapes,
        compiler_params=pltpu.CompilerParams(
            dimension_semantics=("parallel",)),   # megacore batch sharding on v7x
        cost_estimate=pl.CostEstimate(
            flops=flops, transcendentals=transcendentals,
            bytes_accessed=int(bytes_accessed)),
    )(x_in, eps_in, *weights)

    if b_pad != B:
        recon, mu, logvar = recon[:B], mu[:B], logvar[:B]
    return recon, mu, logvar


def init_params(key, input_size, hidden_size, latent_size):
    """PyTorch-style Linear init: weights (out, in), biases (out,), U(±1/sqrt(fan_in))."""
    def linear(k, fan_in, fan_out):
        kw, kb = jax.random.split(k)
        bound = 1.0 / float(jnp.sqrt(jnp.float32(fan_in)))
        w = jax.random.uniform(kw, (fan_out, fan_in), jnp.float32, -bound, bound)
        b = jax.random.uniform(kb, (fan_out,), jnp.float32, -bound, bound)
        return w, b

    k1, k21, k22, k3, k4 = jax.random.split(key, 5)
    w1, b1 = linear(k1, input_size, hidden_size)
    w21, b21 = linear(k21, hidden_size, latent_size)
    w22, b22 = linear(k22, hidden_size, latent_size)
    w3, b3 = linear(k3, latent_size, hidden_size)
    w4, b4 = linear(k4, hidden_size, input_size)
    return (w1, b1, w21, b21, w22, b22, w3, b3, w4, b4)


def vae_reference(x, eps, torch_params):
    """Pure-JAX f32 reference mirroring the PyTorch forward (PyTorch weight layout)."""
    (w1, b1, w21, b21, w22, b22, w3, b3, w4, b4) = torch_params
    h1 = jnp.maximum(x @ w1.T + b1, 0.0)
    mu = h1 @ w21.T + b21
    logvar = h1 @ w22.T + b22
    z = mu + eps * jnp.exp(0.5 * logvar)
    h3 = jnp.maximum(z @ w3.T + b3, 0.0)
    recon = jax.nn.sigmoid(h3 @ w4.T + b4)
    return recon, mu, logvar


if __name__ == "__main__":
    # Flat-vector-per-sample shapes implied by the module; batch chosen so the grid has
    # 4 steps (>= 2 per TensorCore on v7x) with the default tile selection.
    batch, input_size, hidden_size, latent_size = 256, 64, 32, 16

    key = jax.random.PRNGKey(0)
    k_params, k_x, k_eps = jax.random.split(key, 3)

    torch_params = init_params(k_params, input_size, hidden_size, latent_size)
    prep = prepare_params(torch_params, weight_dtype=jnp.bfloat16)   # one-time prep

    x = jax.random.uniform(k_x, (batch, input_size), jnp.float32)
    # reparameterization noise drawn in the wrapper (deterministic given the key)
    # TODO(synk): optionally generate eps in-kernel via pltpu.prng_seed/stateful_normal
    #             to drop this HBM input entirely (changes the random stream vs. torch).
    eps = jax.random.normal(k_eps, (batch, latent_size), jnp.float32)

    fwd = jax.jit(vae_forward)
    recon, mu, logvar = jax.block_until_ready(fwd(x, eps, prep))

    # sanity check against the pure-JAX f32 reference
    r_ref, mu_ref, lv_ref = vae_reference(x, eps, torch_params)
    assert recon.shape == (batch, input_size)
    assert mu.shape == (batch, latent_size)
    assert logvar.shape == (batch, latent_size)
    # Weights run through the MXU in bf16 (f32 accumulation) and sigmoid uses the EUP
    # approximate reciprocal, so compare with a tolerance covering bf16 quantization;
    # passing weight_dtype=jnp.float32 to prepare_params restores ~1e-5 agreement.
    assert jnp.allclose(mu, mu_ref, atol=2e-2, rtol=2e-2)
    assert jnp.allclose(logvar, lv_ref, atol=2e-2, rtol=2e-2)
    assert jnp.allclose(recon, r_ref, atol=2e-2, rtol=2e-2)

    print("KERNEL_OK")
</pallas_src>

<mosaic_0001>
module attributes {stable_mosaic.version = 11 : i64} {
  func.func @vae_kernel(%arg0: i32, %arg1: memref<64x64xf32, #tpu.memory_space<vmem>>, %arg2: memref<64x16xf32, #tpu.memory_space<vmem>>, %arg3: memref<64x32xbf16, #tpu.memory_space<vmem>>, %arg4: memref<1x32xf32, #tpu.memory_space<vmem>>, %arg5: memref<32x16xbf16, #tpu.memory_space<vmem>>, %arg6: memref<1x16xf32, #tpu.memory_space<vmem>>, %arg7: memref<32x16xbf16, #tpu.memory_space<vmem>>, %arg8: memref<1x16xf32, #tpu.memory_space<vmem>>, %arg9: memref<16x32xbf16, #tpu.memory_space<vmem>>, %arg10: memref<1x32xf32, #tpu.memory_space<vmem>>, %arg11: memref<32x64xbf16, #tpu.memory_space<vmem>>, %arg12: memref<1x64xf32, #tpu.memory_space<vmem>>, %arg13: memref<64x64xf32, #tpu.memory_space<vmem>>, %arg14: memref<64x16xf32, #tpu.memory_space<vmem>>, %arg15: memref<64x16xf32, #tpu.memory_space<vmem>>) attributes {dimension_semantics = [#tpu.dimension_semantics<parallel>], iteration_bounds = array<i64: 4>, scalar_prefetch = 0 : i64, scratch_operands = 0 : i64, tpu.core_type = #tpu.core_type<tc>, window_params = [{transform_indices = @transform_0, window_bounds = array<i64: 64, 64>}, {transform_indices = @transform_1, window_bounds = array<i64: 64, 16>}, {pipeline_mode = #tpu.pipeline_mode<synchronous>, transform_indices = @transform_2, window_bounds = array<i64: 64, 32>}, {pipeline_mode = #tpu.pipeline_mode<synchronous>, transform_indices = @transform_3, window_bounds = array<i64: 1, 32>}, {pipeline_mode = #tpu.pipeline_mode<synchronous>, transform_indices = @transform_4, window_bounds = array<i64: 32, 16>}, {pipeline_mode = #tpu.pipeline_mode<synchronous>, transform_indices = @transform_5, window_bounds = array<i64: 1, 16>}, {pipeline_mode = #tpu.pipeline_mode<synchronous>, transform_indices = @transform_6, window_bounds = array<i64: 32, 16>}, {pipeline_mode = #tpu.pipeline_mode<synchronous>, transform_indices = @transform_7, window_bounds = array<i64: 1, 16>}, {pipeline_mode = #tpu.pipeline_mode<synchronous>, transform_indices = @transform_8, window_bounds = array<i64: 16, 32>}, {pipeline_mode = #tpu.pipeline_mode<synchronous>, transform_indices = @transform_9, window_bounds = array<i64: 1, 32>}, {pipeline_mode = #tpu.pipeline_mode<synchronous>, transform_indices = @transform_10, window_bounds = array<i64: 32, 64>}, {pipeline_mode = #tpu.pipeline_mode<synchronous>, transform_indices = @transform_11, window_bounds = array<i64: 1, 64>}, {transform_indices = @transform_12, window_bounds = array<i64: 64, 64>}, {transform_indices = @transform_13, window_bounds = array<i64: 64, 16>}, {transform_indices = @transform_14, window_bounds = array<i64: 64, 16>}]} {
    %c0 = arith.constant 0 : index
    %c0_0 = arith.constant 0 : index
    %0 = vector.load %arg1[%c0, %c0_0] : memref<64x64xf32, #tpu.memory_space<vmem>>, vector<64x64xf32>
    %1 = arith.truncf %0 : vector<64x64xf32> to vector<64x64xbf16>
    %c0_1 = arith.constant 0 : index
    %c0_2 = arith.constant 0 : index
    %2 = vector.load %arg3[%c0_1, %c0_2] : memref<64x32xbf16, #tpu.memory_space<vmem>>, vector<64x32xbf16>
    %cst = arith.constant dense<0.000000e+00> : vector<64x32xf32>
    %3 = tpu.matmul %1, %2, %cst {dimension_numbers = #tpu.dot_dimension_numbers<[1], [0], [0], [1], [0, 0, 1, 1], [], []>} : vector<64x64xbf16>, vector<64x32xbf16>, vector<64x32xf32> -> vector<64x32xf32>
    %c0_3 = arith.constant 0 : index
    %c0_4 = arith.constant 0 : index
    %4 = vector.load %arg4[%c0_3, %c0_4] : memref<1x32xf32, #tpu.memory_space<vmem>>, vector<1x32xf32>
    %5 = vector.broadcast %4 : vector<1x32xf32> to vector<64x32xf32>
    %6 = arith.addf %3, %5 : vector<64x32xf32>
    %cst_5 = arith.constant 0.000000e+00 : f32
    %7 = vector.broadcast %cst_5 : f32 to vector<64x32xf32>
    %8 = arith.maximumf %6, %7 : vector<64x32xf32>
    %9 = arith.truncf %8 : vector<64x32xf32> to vector<64x32xbf16>
    %c0_6 = arith.constant 0 : index
    %c0_7 = arith.constant 0 : index
    %10 = vector.load %arg5[%c0_6, %c0_7] : memref<32x16xbf16, #tpu.memory_space<vmem>>, vector<32x16xbf16>
    %cst_8 = arith.constant dense<0.000000e+00> : vector<64x16xf32>
    %11 = tpu.matmul %9, %10, %cst_8 {dimension_numbers = #tpu.dot_dimension_numbers<[1], [0], [0], [1], [0, 0, 1, 1], [], []>} : vector<64x32xbf16>, vector<32x16xbf16>, vector<64x16xf32> -> vector<64x16xf32>
    %c0_9 = arith.constant 0 : index
    %c0_10 = arith.constant 0 : index
    %12 = vector.load %arg6[%c0_9, %c0_10] : memref<1x16xf32, #tpu.memory_space<vmem>>, vector<1x16xf32>
    %13 = vector.broadcast %12 : vector<1x16xf32> to vector<64x16xf32>
    %14 = arith.addf %11, %13 : vector<64x16xf32>
    %c0_11 = arith.constant 0 : index
    %c0_12 = arith.constant 0 : index
    %15 = vector.load %arg7[%c0_11, %c0_12] : memref<32x16xbf16, #tpu.memory_space<vmem>>, vector<32x16xbf16>
    %cst_13 = arith.constant dense<0.000000e+00> : vector<64x16xf32>
    %16 = tpu.matmul %9, %15, %cst_13 {dimension_numbers = #tpu.dot_dimension_numbers<[1], [0], [0], [1], [0, 0, 1, 1], [], []>} : vector<64x32xbf16>, vector<32x16xbf16>, vector<64x16xf32> -> vector<64x16xf32>
    %c0_14 = arith.constant 0 : index
    %c0_15 = arith.constant 0 : index
    %17 = vector.load %arg8[%c0_14, %c0_15] : memref<1x16xf32, #tpu.memory_space<vmem>>, vector<1x16xf32>
    %18 = vector.broadcast %17 : vector<1x16xf32> to vector<64x16xf32>
    %19 = arith.addf %16, %18 : vector<64x16xf32>
    %c0_16 = arith.constant 0 : index
    %c0_17 = arith.constant 0 : index
    %20 = vector.load %arg14[%c0_16, %c0_17] : memref<64x16xf32, #tpu.memory_space<vmem>>, vector<64x16xf32>
    tpu.vector_store %arg14[%c0_16, %c0_17], %14 {strides = array<i32>} : memref<64x16xf32, #tpu.memory_space<vmem>>, vector<64x16xf32>,
    %c0_18 = arith.constant 0 : index
    %c0_19 = arith.constant 0 : index
    %21 = vector.load %arg15[%c0_18, %c0_19] : memref<64x16xf32, #tpu.memory_space<vmem>>, vector<64x16xf32>
    tpu.vector_store %arg15[%c0_18, %c0_19], %19 {strides = array<i32>} : memref<64x16xf32, #tpu.memory_space<vmem>>, vector<64x16xf32>,
    %c0_20 = arith.constant 0 : index
    %c0_21 = arith.constant 0 : index
    %22 = vector.load %arg2[%c0_20, %c0_21] : memref<64x16xf32, #tpu.memory_space<vmem>>, vector<64x16xf32>
    %cst_22 = arith.constant 5.000000e-01 : f32
    %23 = vector.broadcast %cst_22 : f32 to vector<64x16xf32>
    %24 = arith.mulf %23, %19 : vector<64x16xf32>
    %25 = math.exp %24 : vector<64x16xf32>
    %26 = arith.mulf %22, %25 : vector<64x16xf32>
    %27 = arith.addf %14, %26 : vector<64x16xf32>
    %28 = arith.truncf %27 : vector<64x16xf32> to vector<64x16xbf16>
    %c0_23 = arith.constant 0 : index
    %c0_24 = arith.constant 0 : index
    %29 = vector.load %arg9[%c0_23, %c0_24] : memref<16x32xbf16, #tpu.memory_space<vmem>>, vector<16x32xbf16>
    %cst_25 = arith.constant dense<0.000000e+00> : vector<64x32xf32>
    %30 = tpu.matmul %28, %29, %cst_25 {dimension_numbers = #tpu.dot_dimension_numbers<[1], [0], [0], [1], [0, 0, 1, 1], [], []>} : vector<64x16xbf16>, vector<16x32xbf16>, vector<64x32xf32> -> vector<64x32xf32>
    %c0_26 = arith.constant 0 : index
    %c0_27 = arith.constant 0 : index
    %31 = vector.load %arg10[%c0_26, %c0_27] : memref<1x32xf32, #tpu.memory_space<vmem>>, vector<1x32xf32>
    %32 = vector.broadcast %31 : vector<1x32xf32> to vector<64x32xf32>
    %33 = arith.addf %30, %32 : vector<64x32xf32>
    %cst_28 = arith.constant 0.000000e+00 : f32
    %34 = vector.broadcast %cst_28 : f32 to vector<64x32xf32>
    %35 = arith.maximumf %33, %34 : vector<64x32xf32>
    %36 = arith.truncf %35 : vector<64x32xf32> to vector<64x32xbf16>
    %c0_29 = arith.constant 0 : index
    %c0_30 = arith.constant 0 : index
    %37 = vector.load %arg11[%c0_29, %c0_30] : memref<32x64xbf16, #tpu.memory_space<vmem>>, vector<32x64xbf16>
    %cst_31 = arith.constant dense<0.000000e+00> : vector<64x64xf32>
    %38 = tpu.matmul %36, %37, %cst_31 {dimension_numbers = #tpu.dot_dimension_numbers<[1], [0], [0], [1], [0, 0, 1, 1], [], []>} : vector<64x32xbf16>, vector<32x64xbf16>, vector<64x64xf32> -> vector<64x64xf32>
    %c0_32 = arith.constant 0 : index
    %c0_33 = arith.constant 0 : index
    %39 = vector.load %arg12[%c0_32, %c0_33] : memref<1x64xf32, #tpu.memory_space<vmem>>, vector<1x64xf32>
    %40 = vector.broadcast %39 : vector<1x64xf32> to vector<64x64xf32>
    %41 = arith.addf %38, %40 : vector<64x64xf32>
    %cst_34 = arith.constant 0.000000e+00 : f32
    %42 = vector.broadcast %cst_34 : f32 to vector<64x64xf32>
    %43 = arith.subf %42, %41 : vector<64x64xf32>
    %44 = math.exp %43 : vector<64x64xf32>
    %cst_35 = arith.constant 1.000000e+00 : f32
    %45 = vector.broadcast %cst_35 : f32 to vector<64x64xf32>
    %46 = arith.addf %45, %44 : vector<64x64xf32>
    %47 = tpu.reciprocal %46 {approx = true} : vector<64x64xf32> -> vector<64x64xf32>
    %c0_36 = arith.constant 0 : index
    %c0_37 = arith.constant 0 : index
    %48 = vector.load %arg13[%c0_36, %c0_37] : memref<64x64xf32, #tpu.memory_space<vmem>>, vector<64x64xf32>
    tpu.vector_store %arg13[%c0_36, %c0_37], %47 {strides = array<i32>} : memref<64x64xf32, #tpu.memory_space<vmem>>, vector<64x64xf32>,
    return
  }
  func.func @transform_0(%arg0: i32) -> (i32, i32) {
    %c0_i32 = arith.constant 0 : i32
    %c0_i32_0 = arith.constant 0 : i32
    return %arg0, %c0_i32 : i32, i32
  }
  func.func @transform_1(%arg0: i32) -> (i32, i32) {
    %c0_i32 = arith.constant 0 : i32
    %c0_i32_0 = arith.constant 0 : i32
    return %arg0, %c0_i32 : i32, i32
  }
  func.func @transform_2(%arg0: i32) -> (i32, i32) {
    %c0_i32 = arith.constant 0 : i32
    %c0_i32_0 = arith.constant 0 : i32
    %c0_i32_1 = arith.constant 0 : i32
    return %c0_i32, %c0_i32_0 : i32, i32
  }
  func.func @transform_3(%arg0: i32) -> (i32, i32) {
    %c0_i32 = arith.constant 0 : i32
    %c0_i32_0 = arith.constant 0 : i32
    %c0_i32_1 = arith.constant 0 : i32
    return %c0_i32, %c0_i32_0 : i32, i32
  }
  func.func @transform_4(%arg0: i32) -> (i32, i32) {
    %c0_i32 = arith.constant 0 : i32
    %c0_i32_0 = arith.constant 0 : i32
    %c0_i32_1 = arith.constant 0 : i32
    return %c0_i32, %c0_i32_0 : i32, i32
  }
  func.func @transform_5(%arg0: i32) -> (i32, i32) {
    %c0_i32 = arith.constant 0 : i32
    %c0_i32_0 = arith.constant 0 : i32
    %c0_i32_1 = arith.constant 0 : i32
    return %c0_i32, %c0_i32_0 : i32, i32
  }
  func.func @transform_6(%arg0: i32) -> (i32, i32) {
    %c0_i32 = arith.constant 0 : i32
    %c0_i32_0 = arith.constant 0 : i32
    %c0_i32_1 = arith.constant 0 : i32
    return %c0_i32, %c0_i32_0 : i32, i32
  }
  func.func @transform_7(%arg0: i32) -> (i32, i32) {
    %c0_i32 = arith.constant 0 : i32
    %c0_i32_0 = arith.constant 0 : i32
    %c0_i32_1 = arith.constant 0 : i32
    return %c0_i32, %c0_i32_0 : i32, i32
  }
  func.func @transform_8(%arg0: i32) -> (i32, i32) {
    %c0_i32 = arith.constant 0 : i32
    %c0_i32_0 = arith.constant 0 : i32
    %c0_i32_1 = arith.constant 0 : i32
    return %c0_i32, %c0_i32_0 : i32, i32
  }
  func.func @transform_9(%arg0: i32) -> (i32, i32) {
    %c0_i32 = arith.constant 0 : i32
    %c0_i32_0 = arith.constant 0 : i32
    %c0_i32_1 = arith.constant 0 : i32
    return %c0_i32, %c0_i32_0 : i32, i32
  }
  func.func @transform_10(%arg0: i32) -> (i32, i32) {
    %c0_i32 = arith.constant 0 : i32
    %c0_i32_0 = arith.constant 0 : i32
    %c0_i32_1 = arith.constant 0 : i32
    return %c0_i32, %c0_i32_0 : i32, i32
  }
  func.func @transform_11(%arg0: i32) -> (i32, i32) {
    %c0_i32 = arith.constant 0 : i32
    %c0_i32_0 = arith.constant 0 : i32
    %c0_i32_1 = arith.constant 0 : i32
    return %c0_i32, %c0_i32_0 : i32, i32
  }
  func.func @transform_12(%arg0: i32) -> (i32, i32) {
    %c0_i32 = arith.constant 0 : i32
    %c0_i32_0 = arith.constant 0 : i32
    return %arg0, %c0_i32 : i32, i32
  }
  func.func @transform_13(%arg0: i32) -> (i32, i32) {
    %c0_i32 = arith.constant 0 : i32
    %c0_i32_0 = arith.constant 0 : i32
    return %arg0, %c0_i32 : i32, i32
  }
  func.func @transform_14(%arg0: i32) -> (i32, i32) {
    %c0_i32 = arith.constant 0 : i32
    %c0_i32_0 = arith.constant 0 : i32
    return %arg0, %c0_i32 : i32, i32
  }
}

</mosaic_0001>

<bundles_post_ra>
// kernel: vae_forward.1
= control target key start
LH: loop header
LB: loop body
LE: loop exit
PB: predicated region body
PF: predicated region fallthrough
CT: control target
= control target key end

     0   :  { %s1604_s29 = smov 0   ;;  %s1781_s0 = inlined_call_operand.vmem [shape: f32[256,64], index: 0, kind: input, shape index: {}]   ;;  %s1782_s1 = inlined_call_operand.vmem [shape: f32[256,16], index: 1, kind: input, shape index: {}]   ;;  %s1783_s2 = inlined_call_operand.vmem [shape: bf16[64,32], index: 2, kind: input, shape index: {}]   ;;  %s1784_s3 = inlined_call_operand.vmem [shape: f32[1,32], index: 3, kind: input, shape index: {}]   ;;  %s1785_s4 = inlined_call_operand.vmem [shape: bf16[32,16], index: 4, kind: input, shape index: {}]   ;;  %s1786_s5 = inlined_call_operand.vmem [shape: f32[1,16], index: 5, kind: input, shape index: {}]   ;;  %s1787_s6 = inlined_call_operand.vmem [shape: bf16[32,16], index: 6, kind: input, shape index: {}]   ;;  %s1788_s7 = inlined_call_operand.vmem [shape: f32[1,16], index: 7, kind: input, shape index: {}]   ;;  %s1789_s8 = inlined_call_operand.vmem [shape: bf16[16,32], index: 8, kind: input, shape index: {}]   ;;  %s1790_s9 = inlined_call_operand.vmem [shape: f32[1,32], index: 9, kind: input, shape index: {}]   ;;  %s1791_s10 = inlined_call_operand.vmem [shape: bf16[32,64], index: 10, kind: input, shape index: {}]   ;;  %s1792_s11 = inlined_call_operand.vmem [shape: f32[1,64], index: 11, kind: input, shape index: {}]   ;;  %s1793_s12 = inlined_call_operand.vmem [shape: f32[256,64], index: 12, kind: output, shape index: {0}]   ;;  %s1794_s13 = inlined_call_operand.vmem [shape: f32[256,16], index: 13, kind: output, shape index: {1}]   ;;  %s1795_s14 = inlined_call_operand.vmem [shape: f32[256,16], index: 14, kind: output, shape index: {2}]  }
   0x1 LB: > { %s1308_s30 = sadd.s32 4294967295, %s1527_s29   ;;  %p1312_p0 = scmp.ge.s32.totalorder %s1527_s29, 1  ;;  %s1527_s29 = sphi %s1604_s29, %s25_s29  }
   0x2   : > { %p429_p1 = scmp.lt.s32.totalorder %s1527_s29, 5 }
   0x4   : > { %p430_p2 = pnand %p1312_p0, %p429_p1 }
   0x5   : > { %v1462_v0 = vld [vmem:[%s1783_s2] sm:$0xff] (!%p430_p2)   ;;  %s1313_s17 = sshll.u32 (!%p430_p2), %s1308_s30, 3  ;;  %v1463_v1 = vld [vmem:[%s1783_s2 + $0x8] sm:$0xff] (!%p430_p2)   ;;  %v1464_v2 = vld [vmem:[%s1783_s2 + $0x10] sm:$0xff] (!%p430_p2)   ;;  %vm572_vm0 = vcmask (!%p430_p2), 523264   ;;  %vm685_vm1 = vcmask (!%p430_p2), 261120  }
   0x6   : > { %433 = sbr.rel (%p430_p2) target bundleno = 975 (0x3cf), region = 68  ;;  %p491_p3 = scmp.lt.s32.totalorder (!%p430_p2), %s1313_s17, 31  ;;  %1392 = vmatprep.subr.bf16.mxu0 (!%p430_p2), %v1462_v0  ;;  %v1465_v5 = vld [vmem:[%s1783_s2 + $0x18] sm:$0xff] (!%p430_p2)   ;;  %v1466_v16 = vld [vmem:[%s1785_s4] sm:$0xff] (!%p430_p2)   ;;  %v1467_v17 = vld [vmem:[%s1785_s4 + $0x8] sm:$0xff] (!%p430_p2)   ;;  %vm851_vm2 = vcmask (!%p430_p2), 130048  }
   0x7   : > { %1393 = vmatpush3.bf16.msra.mxu0 (!%p430_p2), %v1462_v0  ;;  %1408 = vmatprep.subr.bf16.mxu1 (!%p430_p2), %v1466_v16  ;;  %v1468_v18 = vld [vmem:[%s1787_s6] sm:$0xff] (!%p430_p2)   ;;  %v1469_v37 = vld [vmem:[%s1787_s6 + $0x8] sm:$0xff] (!%p430_p2)  }
   0x8   : > { %1394 = vmatprep.subr.bf16.mxu0 (!%p430_p2), %v1463_v1  ;;  %1409 = vmatpush3.bf16.msra.mxu1 (!%p430_p2), %v1466_v16  ;;  %v1323_v19 = vld [vmem:[%s1784_s3] ss:$0 sm:$0xff] (!%p430_p2) }
   0x9   : > { %1410 = vmatprep.subr.bf16.mxu1 (!%p430_p2), %v1467_v17  ;;  %v1470_v49 = vld [vmem:[%s1789_s8] sm:$0xff] (!%p430_p2)  }
   0xa   : > { %v1471_v50 = vld [vmem:[%s1791_s10] sm:$0xff] (!%p430_p2)  }
   0xb   : > { %1395 = vmatpush3.bf16.msra.mxu0 (!%p430_p2), %v1463_v1  ;;  %v1332_v51 = vld [vmem:[%s1786_s5] ss:$0 sm:$0xff] (!%p430_p2) }
   0xc   : > { %1396 = vmatprep.subr.bf16.mxu0 (!%p430_p2), %v1464_v2  ;;  %1411 = vmatpush3.bf16.msra.mxu1 (!%p430_p2), %v1467_v17 }
   0xd   : > { %s1797_s17 = smov (!%p491_p3, %s1313_s17), 31  ;;  %1420 = vmatprep.subr.bf16.mxu1 %v1468_v18 }
   0xe   : > { %s1621_s22 = sshll.u32 %s1797_s17, 3 }
   0xf   : > { %s494_s25 = scalar_lea.vmem %s1781_s0, %s1621_s22  ;;  %1397 = vmatpush3.bf16.msra.mxu0 %v1464_v2  ;;  %s512_s17 = scalar_lea.vmem %s1794_s13, %s1621_s22 }
  0x10   : > { %v521_v3 = vld [vmem:[%s494_s25] sm:$0xff]  ;;  %v522_v4 = vld [vmem:[%s494_s25 + $0x8] sm:$0xff]  ;;  %v523_v7 = vld [vmem:[%s494_s25 + $0x10] sm:$0xff]  ;;  %1398 = vmatprep.subr.bf16.mxu0 %v1465_v5  ;;  %s1709_s23 = scalar_lea.vmem %s1795_s14, %s1621_s22  ;;  %s1725_s26 = scalar_lea.vmem %s1782_s1, %s1621_s22 }
  0x11   : > { %v529_v6 = vpack.c.bf16 %v522_v4, %v521_v3  ;;  %v524_v8 = vld [vmem:[%s494_s25 + $0x18] sm:$0xff]  ;;  %v525_v9 = vld [vmem:[%s494_s25 + $0x20] sm:$0xff]  ;;  %v526_v10 = vld [vmem:[%s494_s25 + $0x28] sm:$0xff]  ;;  %s506_s20 = scalar_lea.vmem %s1793_s12, %s1621_s22 }
  0x12   : > { %v530_v11 = vpack.c.bf16 %v524_v8, %v523_v7  ;;  %v531_v12 = vpack.c.bf16 %v526_v10, %v525_v9  ;;  %v527_v13 = vld [vmem:[%s494_s25 + $0x30] sm:$0xff]  ;;  %v528_v14 = vld [vmem:[%s494_s25 + $0x38] sm:$0xff]  ;;  %v1339_v4 = vld [vmem:[%s1788_s7] ss:$0 sm:$0xff] }
  0x13   : > { %1400 = vmatprep.mubr.msk.bf16.mxu0 %vm572_vm0, %v529_v6  ;;  %1399 = vmatpush3.bf16.msra.mxu0 %v1465_v5  ;;  %v532_v15 = vpack.c.bf16 %v528_v14, %v527_v13 }
  0x14   : > { %1432 = vmatprep.subr.bf16.mxu0 %v1470_v49 }
  0x16   : > { %1401 = vmatmul.mubr.msk.bf16.vlgmr.msra.gmra.mrb[0].mxu0 %vm572_vm0, %v530_v11 }
  0x17   : > { %1404 = vmatprep.mubr.msk.bf16.mxu0 %vm572_vm0, %v531_v12  ;;  %1433 = vmatpush3.bf16.msra.mxu0 %v1470_v49 }
  0x1e   : > { %1405 = vmatmul.mubr.msk.bf16.gmra.mrb[4].mxu0 %vm572_vm0, %v532_v15 }
  0xe9   : > { %v1402_v20 = vpop.f32.mrb[0].mxu0 }
  0xea   : > { %v628_v21 = vadd.f32 %v1402_v20, %v1323_v19  ;;  %v619_v22 = vpop.f32.mrb[1].mxu0 }
  0xeb   : > { %v620_v23 = vadd.f32 %v1323_v19, %v619_v22  ;;  %v1403_v24 = vpop.f32.mrb[2].mxu0 }
  0xec   : > { %v631_v25 = vadd.f32 %v1403_v24, %v1323_v19  ;;  %v622_v26 = vpop.f32.mrb[3].mxu0  ;;  %v652_v28 = vmax.f32 %v628_v21, 0.0 }
  0xed   : > { %v623_v27 = vadd.f32 %v1323_v19, %v622_v26  ;;  %v650_v30 = vmax.f32 %v620_v23, 0.0 }
  0xee   : > { %v653_v29 = vmax.f32 %v631_v25, 0.0 }
  0xef   : > { %v651_v31 = vmax.f32 %v623_v27, 0.0 }
  0xf0   : > { %v659_v32 = vpack.c.bf16 %v653_v29, %v652_v28 }
  0xf1   : > { %v1406_v33 = vpop.f32.mrb[4].mxu0  ;;  %v658_v34 = vpack.c.bf16 %v651_v31, %v650_v30 }
  0xf2   : > { %v644_v35 = vadd.f32 %v1406_v33, %v1323_v19  ;;  %v635_v36 = vpop.f32.mrb[5].mxu0 }
  0xf3   : > { %v636_v38 = vadd.f32 %v1323_v19, %v635_v36  ;;  %v1407_v39 = vpop.f32.mrb[6].mxu0  ;;  %1412 = vmatprep.mubr.msk.bf16.mxu1 %vm685_vm1, %v658_v34 }
  0xf4   : > { %v647_v40 = vadd.f32 %v1407_v39, %v1323_v19  ;;  %v638_v41 = vpop.f32.mrb[7].mxu0  ;;  %1413 = vmatmul.mubr.msk.bf16.vlgmr.msra.gmra.mrb[0].mxu1 %vm685_vm1, %v659_v32  ;;  %v656_v43 = vmax.f32 %v644_v35, 0.0  ;;  %v870_v35 = vld [vmem:[%s1725_s26 + $0x10] sm:$0xff] }
  0xf5   : > { %v639_v42 = vadd.f32 %v1323_v19, %v638_v41  ;;  %1421 = vmatpush3.bf16.msra.mxu1 %v1468_v18  ;;  %v654_v45 = vmax.f32 %v636_v38, 0.0  ;;  %v868_v38 = vld [vmem:[%s1725_s26] sm:$0xff] }
  0xf6   : > { %v657_v44 = vmax.f32 %v647_v40, 0.0  ;;  %1422 = vmatprep.subr.bf16.mxu1 %v1469_v37  ;;  %v871_v40 = vld [vmem:[%s1725_s26 + $0x18] sm:$0xff] }
  0xf7   : > { %v655_v46 = vmax.f32 %v639_v42, 0.0 }
  0xf8   : > { %v661_v47 = vpack.c.bf16 %v657_v44, %v656_v43  ;;  %v869_v43 = vld [vmem:[%s1725_s26 + $0x8] sm:$0xff] }
  0xf9   : > { %v660_v48 = vpack.c.bf16 %v655_v46, %v654_v45  ;;  %1423 = vmatpush3.bf16.msra.mxu1 %v1469_v37 }
  0xfa   : > { %1442 = vmatprep.subr.bf16.mxu1 %v1471_v50 }
  0xfb   : > { %1416 = vmatprep.mubr.msk.bf16.mxu1 %vm685_vm1, %v660_v48 }
  0xfc   : > { %1417 = vmatmul.mubr.msk.bf16.gmra.mrb[4].mxu1 %vm685_vm1, %v661_v47 }
  0xfd   : > { %1424 = vmatprep.mubr.msk.bf16.mxu1 %vm685_vm1, %v658_v34 }
 0x104   : > { %1425 = vmatmul.mubr.msk.bf16.vlgmr.msra.gmra.mrb[8].mxu1 %vm685_vm1, %v659_v32 }
 0x105   : > { %1428 = vmatprep.mubr.msk.bf16.mxu1 %vm685_vm1, %v660_v48  ;;  %1443 = vmatpush3.bf16.msra.mxu1 %v1471_v50 }
 0x10c   : > { %1429 = vmatmul.mubr.msk.bf16.gmra.mrb[12].mxu1 %vm685_vm1, %v661_v47 }
 0x1c7   : > { %v1414_v52 = vpop.f32.mrb[0].mxu1 }
 0x1c8   : > { %v1670_v53 = vadd.f32 %v1414_v52, %v1332_v51  ;;  %v732_v54 = vpop.f32.mrb[1].mxu1 }
 0x1c9   : > { %v1672_v55 = vadd.f32 %v1332_v51, %v732_v54  ;;  %v1415_v56 = vpop.f32.mrb[2].mxu1  ;;  %v874_v54 = vld [vmem:[%s1725_s26 + $0x30] sm:$0xff] }
 0x1ca   : > { %854 = vst.msk [vmem:[%s512_s17 + $0x10] sm:$0xff] %vm851_vm2, %v1670_v53  ;;  %v1676_v57 = vadd.f32 %v1415_v56, %v1332_v51  ;;  %v735_v58 = vpop.f32.mrb[3].mxu1 }
 0x1cb   : > { %852 = vst.msk [vmem:[%s512_s17] sm:$0xff] %vm851_vm2, %v1672_v55  ;;  %v1680_v59 = vadd.f32 %v1332_v51, %v735_v58  ;;  %v872_v58 = vld [vmem:[%s1725_s26 + $0x20] sm:$0xff] }
 0x1cc   : > { %855 = vst.msk [vmem:[%s512_s17 + $0x18] sm:$0xff] %vm851_vm2, %v1676_v57 }
 0x1cd   : > { %853 = vst.msk [vmem:[%s512_s17 + $0x8] sm:$0xff] %vm851_vm2, %v1680_v59 }
 0x1cf   : > { %v1418_v60 = vpop.f32.mrb[4].mxu1 }
 0x1d0   : > { %v1686_v61 = vadd.f32 %v1418_v60, %v1332_v51  ;;  %v748_v62 = vpop.f32.mrb[5].mxu1 }
 0x1d1   : > { %v1688_v63 = vadd.f32 %v1332_v51, %v748_v62  ;;  %v1419_v0 = vpop.f32.mrb[6].mxu1 }
 0x1d2   : > { %858 = vst.msk [vmem:[%s512_s17 + $0x30] sm:$0xff] %vm851_vm2, %v1686_v61  ;;  %v1692_v1 = vadd.f32 %v1419_v0, %v1332_v51  ;;  %v751_v2 = vpop.f32.mrb[7].mxu1  ;;  %v875_v0 = vld [vmem:[%s1725_s26 + $0x38] sm:$0xff] }
 0x1d3   : > { %856 = vst.msk [vmem:[%s512_s17 + $0x20] sm:$0xff] %vm851_vm2, %v1688_v63  ;;  %v1696_v3 = vadd.f32 %v1332_v51, %v751_v2 }
 0x1d4   : > { %859 = vst.msk [vmem:[%s512_s17 + $0x38] sm:$0xff] %vm851_vm2, %v1692_v1 }
 0x1d5   : > { %857 = vst.msk [vmem:[%s512_s17 + $0x28] sm:$0xff] %vm851_vm2, %v1696_v3 }
 0x1d7   : > { %v1426_v5 = vpop.f32.mrb[8].mxu1 }
 0x1d8   : > { %v829_v6 = vadd.f32 %v1426_v5, %v1339_v4  ;;  %v820_v7 = vpop.f32.mrb[9].mxu1 }
 0x1d9   : > { %v821_v8 = vadd.f32 %v1339_v4, %v820_v7  ;;  %v1427_v9 = vpop.f32.mrb[10].mxu1 }
 0x1da   : > { %862 = vst.msk [vmem:[%s1709_s23 + $0x10] sm:$0xff] %vm851_vm2, %v829_v6  ;;  %v878_v10 = vmul.f32 0.5, %v829_v6  ;;  %v832_v11 = vadd.f32 %v1427_v9, %v1339_v4  ;;  %v823_v12 = vpop.f32.mrb[11].mxu1 }
 0x1db   : > { %860 = vst.msk [vmem:[%s1709_s23] sm:$0xff] %vm851_vm2, %v821_v8  ;;  %v876_v13 = vmul.f32 0.5, %v821_v8  ;;  %v824_v14 = vadd.f32 %v1339_v4, %v823_v12 }
 0x1dc   : > { %v888_v15 = vmul.f32 1.442695, %v878_v10  ;;  %863 = vst.msk [vmem:[%s1709_s23 + $0x18] sm:$0xff] %vm851_vm2, %v832_v11  ;;  %v879_v16 = vmul.f32 0.5, %v832_v11 }
 0x1dd   : > { %v884_v17 = vmul.f32 1.442695, %v876_v13  ;;  %861 = vst.msk [vmem:[%s1709_s23 + $0x8] sm:$0xff] %vm851_vm2, %v824_v14  ;;  %v877_v18 = vmul.f32 0.5, %v824_v14  ;;  %v1472_v13 = vld [vmem:[%s1791_s10 + $0x8] sm:$0xff]  }
 0x1de   : > { %1473 = vpow2.f32 %v888_v15  ;;  %v890_v19 = vmul.f32 1.442695, %v879_v16  ;;  %1444 = vmatprep.subr.bf16.mxu1 %v1472_v13 }
 0x1df   : > { %1475 = vpow2.f32 %v884_v17  ;;  %v886_v20 = vmul.f32 1.442695, %v877_v18  ;;  %v1430_v21 = vpop.f32.mrb[12].mxu1  ;;  %1445 = vmatpush3.bf16.msra.mxu1 %v1472_v13 }
 0x1e0   : > { %1477 = vpow2.f32 %v890_v19  ;;  %v845_v22 = vadd.f32 %v1430_v21, %v1339_v4  ;;  %v836_v23 = vpop.f32.mrb[13].mxu1 }
 0x1e1   : > { %1479 = vpow2.f32 %v886_v20  ;;  %v837_v24 = vadd.f32 %v1339_v4, %v836_v23  ;;  %v1431_v25 = vpop.f32.mrb[14].mxu1 }
 0x1e2   : > { %866 = vst.msk [vmem:[%s1709_s23 + $0x30] sm:$0xff] %vm851_vm2, %v845_v22  ;;  %v882_v26 = vmul.f32 0.5, %v845_v22  ;;  %v848_v27 = vadd.f32 %v1431_v25, %v1339_v4  ;;  %v839_v28 = vpop.f32.mrb[15].mxu1 }
 0x1e3   : > { %864 = vst.msk [vmem:[%s1709_s23 + $0x20] sm:$0xff] %vm851_vm2, %v837_v24  ;;  %v880_v29 = vmul.f32 0.5, %v837_v24  ;;  %v840_v30 = vadd.f32 %v1339_v4, %v839_v28  ;;  %v873_v4 = vld [vmem:[%s1725_s26 + $0x28] sm:$0xff] }
 0x1e4   : > { %v896_v31 = vmul.f32 1.442695, %v882_v26  ;;  %867 = vst.msk [vmem:[%s1709_s23 + $0x38] sm:$0xff] %vm851_vm2, %v848_v27  ;;  %v883_v32 = vmul.f32 0.5, %v848_v27 }
 0x1e5   : > { %v892_v33 = vmul.f32 1.442695, %v880_v29  ;;  %865 = vst.msk [vmem:[%s1709_s23 + $0x28] sm:$0xff] %vm851_vm2, %v840_v30  ;;  %v881_v34 = vmul.f32 0.5, %v840_v30 }
 0x1e6   : > { %1481 = vpow2.f32 %v896_v31  ;;  %v898_v36 = vmul.f32 1.442695, %v883_v32 }
 0x1e7   : > { %1483 = vpow2.f32 %v892_v33  ;;  %v894_v37 = vmul.f32 1.442695, %v881_v34 }
 0x1e8   : > { %v1474_v39 = vpop.eup %1473  ;;  %1485 = vpow2.f32 %v898_v36 }
 0x1e9   : > { %v1476_v41 = vpop.eup %1475  ;;  %v902_v42 = vmul.f32 %v1474_v39, %v870_v35  ;;  %1487 = vpow2.f32 %v894_v37  ;;  %v1352_v39 = vld [vmem:[%s1792_s11] ss:$0 sm:$0xff] }
 0x1ea   : > { %v1478_v44 = vpop.eup %1477  ;;  %v900_v45 = vmul.f32 %v1476_v41, %v868_v38 }
 0x1eb   : > { %v1480_v46 = vpop.eup %1479  ;;  %v910_v47 = vadd.f32 %v902_v42, %v1670_v53  ;;  %v903_v48 = vmul.f32 %v1478_v44, %v871_v40 }
 0x1ec   : > { %v901_v49 = vmul.f32 %v1480_v46, %v869_v43  ;;  %v908_v50 = vadd.f32 %v900_v45, %v1672_v55 }
 0x1ed   : > { %v911_v51 = vadd.f32 %v903_v48, %v1676_v57 }
 0x1ee   : > { %v909_v52 = vadd.f32 %v901_v49, %v1680_v59 }
 0x1ef   : > { %v917_v56 = vpack.c.bf16 %v911_v51, %v910_v47 }
 0x1f0   : > { %v1482_v60 = vpop.eup %1481  ;;  %v916_v62 = vpack.c.bf16 %v909_v52, %v908_v50 }
 0x1f1   : > { %v1484_v2 = vpop.eup %1483  ;;  %v906_v5 = vmul.f32 %v1482_v60, %v874_v54 }
 0x1f2   : > { %v1486_v6 = vpop.eup %1485  ;;  %1434 = vmatprep.mubr.msk.bf16.mxu0 %vm851_vm2, %v916_v62  ;;  %v904_v53 = vmul.f32 %v1484_v2, %v872_v58 }
 0x1f3   : > { %v1488_v7 = vpop.eup %1487  ;;  %1435 = vmatmul.mubr.msk.bf16.vlgmr.msra.gmra.mrb[8].mxu0 %vm851_vm2, %v917_v56  ;;  %v907_v55 = vmul.f32 %v1486_v6, %v875_v0  ;;  %v914_v57 = vadd.f32 %v906_v5, %v1686_v61  ;;  %v1346_v61 = vld [vmem:[%s1790_s9] ss:$0 sm:$0xff] }
 0x1f4   : > { %v905_v59 = vmul.f32 %v1488_v7, %v873_v4  ;;  %v912_v8 = vadd.f32 %v904_v53, %v1688_v63 }
 0x1f5   : > { %v915_v9 = vadd.f32 %v907_v55, %v1692_v1 }
 0x1f6   : > { %v913_v10 = vadd.f32 %v905_v59, %v1696_v3 }
 0x1f7   : > { %v919_v11 = vpack.c.bf16 %v915_v9, %v914_v57 }
 0x1f8   : > { %v918_v12 = vpack.c.bf16 %v913_v10, %v912_v8 }
 0x1fa   : > { %1438 = vmatprep.mubr.msk.bf16.mxu0 %vm851_vm2, %v918_v12 }
 0x1fb   : > { %1439 = vmatmul.mubr.msk.bf16.gmra.mrb[12].mxu0 %vm851_vm2, %v919_v11 }
 0x2c6   : > { %v1436_v63 = vpop.f32.mrb[8].mxu0 }
 0x2c7   : > { %v990_v1 = vadd.f32 %v1436_v63, %v1346_v61  ;;  %v981_v14 = vpop.f32.mrb[9].mxu0 }
 0x2c8   : > { %v982_v3 = vadd.f32 %v1346_v61, %v981_v14  ;;  %v1437_v15 = vpop.f32.mrb[10].mxu0 }
 0x2c9   : > { %v993_v16 = vadd.f32 %v1437_v15, %v1346_v61  ;;  %v984_v17 = vpop.f32.mrb[11].mxu0  ;;  %v1014_v19 = vmax.f32 %v990_v1, 0.0 }
 0x2ca   : > { %v985_v18 = vadd.f32 %v1346_v61, %v984_v17  ;;  %v1012_v21 = vmax.f32 %v982_v3, 0.0 }
 0x2cb   : > { %v1015_v20 = vmax.f32 %v993_v16, 0.0 }
 0x2cc   : > { %v1013_v22 = vmax.f32 %v985_v18, 0.0 }
 0x2cd   : > { %v1021_v23 = vpack.c.bf16 %v1015_v20, %v1014_v19 }
 0x2ce   : > { %v1020_v24 = vpack.c.bf16 %v1013_v22, %v1012_v21  ;;  %v1440_v25 = vpop.f32.mrb[12].mxu0 }
 0x2cf   : > { %v1006_v26 = vadd.f32 %v1440_v25, %v1346_v61  ;;  %v997_v27 = vpop.f32.mrb[13].mxu0 }
 0x2d0   : > { %v998_v28 = vadd.f32 %v1346_v61, %v997_v27  ;;  %v1441_v29 = vpop.f32.mrb[14].mxu0  ;;  %1446 = vmatprep.mubr.msk.bf16.mxu1 %vm685_vm1, %v1020_v24 }
 0x2d1   : > { %v1009_v30 = vadd.f32 %v1441_v29, %v1346_v61  ;;  %v1000_v31 = vpop.f32.mrb[15].mxu0  ;;  %1447 = vmatmul.mubr.msk.bf16.vlgmr.msra.gmra.mrb[16].mxu1 %vm685_vm1, %v1021_v23  ;;  %v1018_v33 = vmax.f32 %v1006_v26, 0.0 }
 0x2d2   : > { %v1001_v32 = vadd.f32 %v1346_v61, %v1000_v31  ;;  %v1016_v35 = vmax.f32 %v998_v28, 0.0 }
 0x2d3   : > { %v1019_v34 = vmax.f32 %v1009_v30, 0.0 }
 0x2d4   : > { %v1017_v36 = vmax.f32 %v1001_v32, 0.0 }
 0x2d5   : > { %v1023_v37 = vpack.c.bf16 %v1019_v34, %v1018_v33 }
 0x2d6   : > { %v1022_v38 = vpack.c.bf16 %v1017_v36, %v1016_v35 }
 0x2d8   : > { %1450 = vmatprep.mubr.msk.bf16.mxu1 %vm685_vm1, %v1022_v38 }
 0x2d9   : > { %1451 = vmatmul.mubr.msk.bf16.gmra.mrb[20].mxu1 %vm685_vm1, %v1023_v37 }
 0x3a4   : > { %v1448_v40 = vpop.f32.mrb[16].mxu1 }
 0x3a5   : > { %v1102_v41 = vadd.f32 %v1448_v40, %v1352_v39  ;;  %v1093_v42 = vpop.f32.mrb[17].mxu1 }
 0x3a6   : > { %v1094_v43 = vadd.f32 %v1352_v39, %v1093_v42  ;;  %v1449_v44 = vpop.f32.mrb[18].mxu1 }
 0x3a7   : > { %v1126_v45 = vsub.f32 0.0, %v1102_v41  ;;  %v1105_v46 = vadd.f32 %v1449_v44, %v1352_v39  ;;  %v1096_v47 = vpop.f32.mrb[19].mxu1 }
 0x3a8   : > { %v1124_v48 = vsub.f32 0.0, %v1094_v43  ;;  %v1097_v49 = vadd.f32 %v1352_v39, %v1096_v47 }
 0x3a9   : > { %v1136_v50 = vmul.f32 1.442695, %v1126_v45  ;;  %v1127_v51 = vsub.f32 0.0, %v1105_v46 }
 0x3aa   : > { %v1132_v52 = vmul.f32 1.442695, %v1124_v48  ;;  %v1125_v54 = vsub.f32 0.0, %v1097_v49 }
 0x3ab   : > { %1489 = vpow2.f32 %v1136_v50  ;;  %v1138_v56 = vmul.f32 1.442695, %v1127_v51 }
 0x3ac   : > { %1491 = vpow2.f32 %v1132_v52  ;;  %v1134_v58 = vmul.f32 1.442695, %v1125_v54  ;;  %v1452_v60 = vpop.f32.mrb[20].mxu1 }
 0x3ad   : > { %1493 = vpow2.f32 %v1138_v56  ;;  %v1118_v62 = vadd.f32 %v1452_v60, %v1352_v39  ;;  %v1109_v0 = vpop.f32.mrb[21].mxu1 }
 0x3ae   : > { %1495 = vpow2.f32 %v1134_v58  ;;  %v1110_v2 = vadd.f32 %v1352_v39, %v1109_v0  ;;  %v1453_v4 = vpop.f32.mrb[22].mxu1 }
 0x3af   : > { %v1130_v5 = vsub.f32 0.0, %v1118_v62  ;;  %v1121_v6 = vadd.f32 %v1453_v4, %v1352_v39  ;;  %v1112_v53 = vpop.f32.mrb[23].mxu1 }
 0x3b0   : > { %v1128_v7 = vsub.f32 0.0, %v1110_v2  ;;  %v1113_v55 = vadd.f32 %v1352_v39, %v1112_v53 }
 0x3b1   : > { %v1144_v57 = vmul.f32 1.442695, %v1130_v5  ;;  %v1131_v59 = vsub.f32 0.0, %v1121_v6 }
 0x3b2   : > { %v1140_v8 = vmul.f32 1.442695, %v1128_v7  ;;  %v1129_v9 = vsub.f32 0.0, %v1113_v55 }
 0x3b3   : > { %1497 = vpow2.f32 %v1144_v57  ;;  %v1146_v10 = vmul.f32 1.442695, %v1131_v59 }
 0x3b4   : > { %1499 = vpow2.f32 %v1140_v8  ;;  %v1142_v11 = vmul.f32 1.442695, %v1129_v9 }
 0x3b5   : > { %v1490_v12 = vpop.eup %1489  ;;  %1501 = vpow2.f32 %v1146_v10 }
 0x3b6   : > { %v1492_v13 = vpop.eup %1491  ;;  %v1150_v61 = vadd.f32 1.0, %v1490_v12  ;;  %1503 = vpow2.f32 %v1142_v11 }
 0x3b7   : > { %v1494_v63 = vpop.eup %1493  ;;  %v1148_v1 = vadd.f32 1.0, %v1492_v13 }
 0x3b8   : > { %v1496_v14 = vpop.eup %1495  ;;  %1505 = vrcp.f32 %v1150_v61  ;;  %v1151_v3 = vadd.f32 1.0, %v1494_v63 }
 0x3b9   : > { %1507 = vrcp.f32 %v1148_v1  ;;  %v1149_v15 = vadd.f32 1.0, %v1496_v14 }
 0x3ba   : > { %1509 = vrcp.f32 %v1151_v3 }
 0x3bb   : > { %1511 = vrcp.f32 %v1149_v15 }
 0x3bd   : > { %v1498_v16 = vpop.eup %1497 }
 0x3be   : > { %v1500_v17 = vpop.eup %1499  ;;  %v1154_v18 = vadd.f32 1.0, %v1498_v16 }
 0x3bf   : > { %v1502_v19 = vpop.eup %1501  ;;  %v1152_v20 = vadd.f32 1.0, %v1500_v17 }
 0x3c0   : > { %v1504_v21 = vpop.eup %1503  ;;  %1513 = vrcp.f32 %v1154_v18  ;;  %v1155_v22 = vadd.f32 1.0, %v1502_v19 }
 0x3c1   : > { %1515 = vrcp.f32 %v1152_v20  ;;  %v1153_v23 = vadd.f32 1.0, %v1504_v21 }
 0x3c2   : > { %v1506_v24 = vpop.eup %1505  ;;  %1517 = vrcp.f32 %v1155_v22 }
 0x3c3   : > { %v1508_v25 = vpop.eup %1507  ;;  %1166 = vst.msk [vmem:[%s506_s20 + $0x10] sm:$0xff] %vm572_vm0, %v1506_v24  ;;  %1519 = vrcp.f32 %v1153_v23 }
 0x3c4   : > { %v1510_v26 = vpop.eup %1509  ;;  %1164 = vst.msk [vmem:[%s506_s20] sm:$0xff] %vm572_vm0, %v1508_v25 }
 0x3c5   : > { %v1512_v27 = vpop.eup %1511  ;;  %1167 = vst.msk [vmem:[%s506_s20 + $0x18] sm:$0xff] %vm572_vm0, %v1510_v26 }
 0x3c6   : > { %1165 = vst.msk [vmem:[%s506_s20 + $0x8] sm:$0xff] %vm572_vm0, %v1512_v27 }
 0x3ca   : > { %v1514_v28 = vpop.eup %1513 }
 0x3cb   : > { %v1516_v29 = vpop.eup %1515  ;;  %1170 = vst.msk [vmem:[%s506_s20 + $0x30] sm:$0xff] %vm572_vm0, %v1514_v28 }
 0x3cc   : > { %v1518_v30 = vpop.eup %1517  ;;  %1168 = vst.msk [vmem:[%s506_s20 + $0x20] sm:$0xff] %vm572_vm0, %v1516_v29 }
 0x3cd   : > { %v1520_v31 = vpop.eup %1519  ;;  %1171 = vst.msk [vmem:[%s506_s20 + $0x38] sm:$0xff] %vm572_vm0, %v1518_v30 }
 0x3ce   : > { %1169 = vst.msk [vmem:[%s506_s20 + $0x28] sm:$0xff] %vm572_vm0, %v1520_v31 }
 0x3cf PF: > { %s25_s29 = sadd.s32 1, %s1527_s29  }
 0x3d0   : > { %p22_p4 = scmp.ge.s32.totalorder %s25_s29, 6  }
 0x3d2   :  { %24 = sbr.rel (!%p22_p4) target bundleno = 1 (0x1), region = 125 }

</bundles_post_ra>
